<compile_context>
chip_gen: v5e
topology: v5e:2x2
jax: 0.10.0
libtpu: 0.0.40
codegen_flags: <defaults>
</compile_context>

<pallas_src>
import functools

import jax
import jax.numpy as jnp
import numpy as np
from jax.experimental import pallas as pl
from jax.experimental.pallas import tpu as pltpu


# -----------------------------------------------------------------------------
# Pallas kernel: batch block folded into the row (M) dimension.
# -----------------------------------------------------------------------------
def _encoder_block_kernel(x_ref, lane_ref, wbig_ref, bpw_ref, rsel_ref, ssel_ref,
                          out_ref, skip_ref, *, cin, cout):
    nb, img_h, wc = x_ref.shape            # (Nb, H, W*Cin)
    nbh = nb * img_h
    wco = wbig_ref.shape[1]                # W*Cout
    wcoh = ssel_ref.shape[1]               # (W//2)*Cout

    # Fold the batch block into the matmul M dimension (layout-free reshape:
    # leading dims merge, lane dim untouched).
    x = x_ref[...].reshape(nbh, wc)

    lane = lane_ref[...]                   # (6, W*Cin) per-lane constants
    w_c, w_up, w_dn = lane[0:1], lane[1:2], lane[2:3]
    w_lf, w_rt, b_dw = lane[3:4], lane[4:5], lane[5:6]

    # Per-image row index -> zero-padding masks for the (3,1) taps.  The (1,3)
    # boundary masks are already folded into w_lf / w_rt in the wrapper.
    hid = jax.lax.broadcasted_iota(jnp.int32, (nbh, wc), 0) % img_h

    # AxialDW taps as XLU rolls + per-lane VPU FMAs (exact f32).  Non-negative
    # shifts only; wrapped rows are masked, wrapped lanes carry zero weight.
    x_up = pltpu.roll(x, 1, axis=0)                 # row h-1
    x_dn = pltpu.roll(x, nbh - 1, axis=0)           # row h+1
    x_lf = pltpu.roll(x, cin, axis=1)               # col w-1 (packed lanes)
    x_rt = pltpu.roll(x, wc - cin, axis=1)          # col w+1

    skip = (x * w_c                                               # identity + center taps
            + jnp.where(hid == 0, 0.0, x_up) * w_up
            + jnp.where(hid == img_h - 1, 0.0, x_dn) * w_dn
            + x_lf * w_lf
            + x_rt * w_rt
            + b_dw)                                               # (NbH, W*Cin) f32
    skip_ref[...] = skip.reshape(nb, img_h, wc)                   # full-lane store

    # 1x1 conv + folded BatchNorm + ReLU: one bf16 MXU matmul (f32 accumulate),
    # f32 VPU epilogue.
    y = jnp.dot(skip.astype(jnp.bfloat16), wbig_ref[...],
                preferred_element_type=jnp.float32)               # (NbH, W*Cout)
    y = jnp.maximum(y + bpw_ref[...], 0.0)

    # 2x2 max pool, exact in f32: VPU max against an XLU-rolled copy along each
    # axis, then a 0/1 selection matmul keeps only the even rows / columns.
    rowmax = jnp.maximum(y, pltpu.roll(y, nbh - 1, axis=0))       # max(y[r], y[r+1])
    hpool = jnp.dot(rsel_ref[...], rowmax,
                    preferred_element_type=jnp.float32)           # (NbH//2, W*Cout)
    colmax = jnp.maximum(hpool, pltpu.roll(hpool, wco - cout, axis=1))
    out = jnp.dot(colmax, ssel_ref[...],
                  preferred_element_type=jnp.float32)             # (NbH//2, Wh*Cout)
    out_ref[...] = out.reshape(nb, img_h // 2, wcoh)


def _pick_batch_block(n, per_elem_bytes, budget_bytes=4 << 20):
    """Largest divisor of n that (a) keeps >=2 grid steps when n >= 2 and
    (b) keeps the per-step activation tiles within a VMEM-aware budget."""
    max_nb = max(1, n // 2)
    best = 1
    for cand in range(1, max_nb + 1):
        if n % cand == 0 and cand * per_elem_bytes <= budget_bytes:
            best = cand
    return best


# -----------------------------------------------------------------------------
# Factory: builds the packed constants ONCE per weight set and returns jitted
# forward functions (packed-layout core + NCHW boundary wrapper).
# -----------------------------------------------------------------------------
def make_encoder_block_mamba(params, N, H, W):
    f32 = np.float32
    w_dwh = np.asarray(params["w_dwh"], f32)                  # (3, Cin)
    w_dww = np.asarray(params["w_dww"], f32)                  # (3, Cin)
    b_dwh = np.asarray(params["b_dwh"], f32).reshape(-1)      # (Cin,)
    b_dww = np.asarray(params["b_dww"], f32).reshape(-1)      # (Cin,)
    w_pw = np.asarray(params["w_pw"], f32)                    # (Cin, Cout)
    b_pw = np.asarray(params["b_pw"], f32).reshape(-1)        # (Cout,)
    gamma = np.asarray(params["bn_gamma"], f32)
    beta = np.asarray(params["bn_beta"], f32)
    mean = np.asarray(params["bn_mean"], f32)
    var = np.asarray(params["bn_var"], f32)

    Cin, Cout = w_dwh.shape[1], w_pw.shape[1]
    assert H % 2 == 0 and W % 2 == 0, "MaxPool2d(2,2) needs even H and W"
    assert H % 8 == 0, "row axis should be a sublane multiple"
    Hh, Wh = H // 2, W // 2
    WC, WCo, WCoh = W * Cin, W * Cout, Wh * Cout
    assert WC % 128 == 0 and WCo % 128 == 0 and WCoh % 128 == 0, \
        "packed lane axis must be a multiple of 128 for dense vregs"

    per_elem_bytes = 4 * (2 * H * WC + Hh * WCoh)             # x + skip + pooled
    Nb = _pick_batch_block(N, per_elem_bytes)
    NbH = Nb * H
    P = NbH // 2

    # ---- depthwise per-lane constants (lane boundary masks baked in) --------
    w_c = np.tile(1.0 + w_dwh[1] + w_dww[1], W)               # identity + centers
    w_up = np.tile(w_dwh[0], W)
    w_dn = np.tile(w_dwh[2], W)
    w_lf = np.tile(w_dww[0], W); w_lf[:Cin] = 0.0             # zero pad at w=0
    w_rt = np.tile(w_dww[2], W); w_rt[-Cin:] = 0.0            # zero pad at w=W-1
    b_dw = np.tile(b_dwh + b_dww, W)
    lane_np = np.stack([w_c, w_up, w_dn, w_lf, w_rt, b_dw], 0)  # (6, WC)

    # ---- 1x1 conv + BatchNorm(inference) folded, block-diagonal over W ------
    eps = 1e-5
    scale = gamma / np.sqrt(var + eps)
    shift = beta - mean * scale
    w_eff = w_pw * scale[None, :]                             # (Cin, Cout)
    b_eff = b_pw * scale + shift                              # (Cout,)
    wbig_np = np.kron(np.eye(W, dtype=f32), w_eff)            # (WC, WCo)
    bpw_np = np.tile(b_eff, W)[None, :]                       # (1, WCo)

    # ---- 0/1 pool selection matrices (exact f32 selection) ------------------
    rsel_np = np.zeros((P, NbH), f32)
    rsel_np[np.arange(P), 2 * np.arange(P)] = 1.0             # pick even rows
    ssel_np = np.zeros((WCo, WCoh), f32)
    wi = np.repeat(np.arange(Wh), Cout)
    ci = np.tile(np.arange(Cout), Wh)
    ssel_np[2 * wi * Cout + ci, wi * Cout + ci] = 1.0         # pick even columns

    # Device-resident constants (transferred once, reused every call).
    lane_c = jnp.asarray(lane_np)
    wbig_c = jnp.asarray(wbig_np).astype(jnp.bfloat16)        # bf16 MXU operand
    bpw_c = jnp.asarray(bpw_np)
    rsel_c = jnp.asarray(rsel_np)
    ssel_c = jnp.asarray(ssel_np)

    const_bytes = (lane_np.nbytes + wbig_np.size * 2 + bpw_np.nbytes
                   + rsel_np.nbytes + ssel_np.nbytes)
    vmem_bytes = int(2 * Nb * per_elem_bytes + 2 * const_bytes + (2 << 20))
    vmem_bytes = min(max(vmem_bytes, 4 << 20), 32 << 20)      # v7x-safe cap

    kernel = functools.partial(_encoder_block_kernel, cin=Cin, cout=Cout)

    call = pl.pallas_call(
        kernel,
        out_shape=(jax.ShapeDtypeStruct((N, Hh, WCoh), jnp.float32),   # pooled
                   jax.ShapeDtypeStruct((N, H, WC), jnp.float32)),     # skip
        grid_spec=pltpu.PrefetchScalarGridSpec(
            num_scalar_prefetch=0,
            grid=(N // Nb,),
            in_specs=[
                pl.BlockSpec((Nb, H, WC), lambda b: (b, 0, 0)),        # x packed
                pl.BlockSpec((6, WC), lambda b: (0, 0)),               # dw lane taps
                pl.BlockSpec((WC, WCo), lambda b: (0, 0)),             # pw+BN (bf16)
                pl.BlockSpec((1, WCo), lambda b: (0, 0)),              # pw+BN bias
                pl.BlockSpec((P, NbH), lambda b: (0, 0)),              # row-pool select
                pl.BlockSpec((WCo, WCoh), lambda b: (0, 0)),           # col-pool select
            ],
            out_specs=(
                pl.BlockSpec((Nb, Hh, WCoh), lambda b: (b, 0, 0)),
                pl.BlockSpec((Nb, H, WC), lambda b: (b, 0, 0)),
            ),
        ),
        compiler_params=pltpu.CompilerParams(
            dimension_semantics=("parallel",),        # batch axis: megacore on v7x
            vmem_limit_bytes=vmem_bytes),
    )

    @jax.jit
    def _fwd(xp, lane, wbig, bpw, rsel, ssel):
        return call(xp, lane, wbig, bpw, rsel, ssel)

    def forward_packed(xp):
        """xp: (N, H, W*Cin) float32, channel-last packed layout."""
        return _fwd(xp, lane_c, wbig_c, bpw_c, rsel_c, ssel_c)

    def forward_nchw(x_nchw):
        # Layout conversion at the model boundary only; chained encoder blocks
        # should keep the packed (N, H, W*C) layout and skip these transposes.
        xp = jnp.transpose(x_nchw, (0, 2, 3, 1)).astype(jnp.float32).reshape(N, H, WC)
        pooled_p, skip_p = forward_packed(xp)
        pooled = jnp.transpose(pooled_p.reshape(N, Hh, Wh, Cout), (0, 3, 1, 2))
        skip = jnp.transpose(skip_p.reshape(N, H, W, Cin), (0, 3, 1, 2))
        return pooled, skip

    return forward_nchw, forward_packed


# -----------------------------------------------------------------------------
# Pure-JAX (XLA) reference for correctness checking.
# -----------------------------------------------------------------------------
def _reference(x_nchw, params):
    Cin = x_nchw.shape[1]
    Cout = params["w_pw"].shape[1]
    dn = ("NCHW", "OIHW", "NCHW")
    x = x_nchw.astype(jnp.float32)          # ResMambaBlock -> identity (see TODO)

    wh = jnp.transpose(params["w_dwh"])[:, None, :, None]    # (Cin,1,3,1)
    dwh = jax.lax.conv_general_dilated(
        x, wh, (1, 1), "SAME", feature_group_count=Cin,
        dimension_numbers=dn) + params["b_dwh"].reshape(1, Cin, 1, 1)

    ww = jnp.transpose(params["w_dww"])[:, None, None, :]    # (Cin,1,1,3)
    dww = jax.lax.conv_general_dilated(
        x, ww, (1, 1), "SAME", feature_group_count=Cin,
        dimension_numbers=dn) + params["b_dww"].reshape(1, Cin, 1, 1)

    skip = x + dwh + dww

    wpw = jnp.transpose(params["w_pw"])[:, :, None, None]    # (Cout,Cin,1,1)
    y = jax.lax.conv_general_dilated(
        skip, wpw, (1, 1), "SAME",
        dimension_numbers=dn) + params["b_pw"].reshape(1, Cout, 1, 1)

    eps = 1e-5
    scale = params["bn_gamma"] / jnp.sqrt(params["bn_var"] + eps)
    bias = params["bn_beta"] - params["bn_mean"] * scale
    y = jnp.maximum(y * scale.reshape(1, Cout, 1, 1)
                    + bias.reshape(1, Cout, 1, 1), 0.0)

    pooled = jax.lax.reduce_window(y, -jnp.inf, jax.lax.max,
                                   (1, 1, 2, 2), (1, 1, 2, 2), "VALID")
    return pooled, skip


def _make_params(key, in_c, out_c):
    ks = jax.random.split(key, 10)
    return {
        "w_dwh": jax.random.normal(ks[0], (3, in_c), jnp.float32) * 0.2,
        "b_dwh": jax.random.normal(ks[1], (1, in_c), jnp.float32) * 0.1,
        "w_dww": jax.random.normal(ks[2], (3, in_c), jnp.float32) * 0.2,
        "b_dww": jax.random.normal(ks[3], (1, in_c), jnp.float32) * 0.1,
        "w_pw":  jax.random.normal(ks[4], (in_c, out_c), jnp.float32) * 0.2,
        "b_pw":  jax.random.normal(ks[5], (1, out_c), jnp.float32) * 0.1,
        "bn_gamma": jax.random.uniform(ks[6], (out_c,), jnp.float32, 0.5, 1.5),
        "bn_beta":  jax.random.normal(ks[7], (out_c,), jnp.float32) * 0.1,
        "bn_mean":  jax.random.normal(ks[8], (out_c,), jnp.float32) * 0.1,
        "bn_var":   jax.random.uniform(ks[9], (out_c,), jnp.float32, 0.5, 1.5),
    }


if __name__ == "__main__":
    # Small shapes; W*Cin = 128, W*Cout = 256, (W//2)*Cout = 128 keep the packed
    # lane axis a multiple of 128 (fully dense vregs, unmasked stores).
    N, in_c, out_c, H, W = 2, 8, 16, 16, 16
    key = jax.random.PRNGKey(0)
    kx, kp = jax.random.split(key)
    x = jax.random.normal(kx, (N, in_c, H, W), jnp.float32)   # NCHW, like PyTorch
    params = _make_params(kp, in_c, out_c)

    forward_nchw, _ = make_encoder_block_mamba(params, N, H, W)

    pooled, skip = forward_nchw(x)
    pooled = jax.block_until_ready(pooled)
    skip = jax.block_until_ready(skip)

    ref_pooled, ref_skip = _reference(x, params)
    # skip is computed entirely in f32 (rolls + VPU FMAs) -> tight tolerance.
    np.testing.assert_allclose(np.asarray(skip), np.asarray(ref_skip),
                               rtol=1e-4, atol=1e-4)
    # pooled goes through the bf16-operand pw+BN matmul (f32 accumulate) ->
    # bf16 rounding of skip / weights loosens the tolerance to ~1e-2.
    np.testing.assert_allclose(np.asarray(pooled), np.asarray(ref_pooled),
                               rtol=2e-2, atol=3e-2)

    assert pooled.shape == (N, out_c, H // 2, W // 2)
    assert skip.shape == (N, in_c, H, W)
    print("KERNEL_OK")
</pallas_src>

<mosaic_0001>
module attributes {stable_mosaic.version = 11 : i64} {
  func.func @_encoder_block_kernel(%arg0: i32, %arg1: memref<1x16x128xf32, #tpu.memory_space<vmem>>, %arg2: memref<6x128xf32, #tpu.memory_space<vmem>>, %arg3: memref<128x256xbf16, #tpu.memory_space<vmem>>, %arg4: memref<1x256xf32, #tpu.memory_space<vmem>>, %arg5: memref<8x16xf32, #tpu.memory_space<vmem>>, %arg6: memref<256x128xf32, #tpu.memory_space<vmem>>, %arg7: memref<1x8x128xf32, #tpu.memory_space<vmem>>, %arg8: memref<1x16x128xf32, #tpu.memory_space<vmem>>) attributes {dimension_semantics = [#tpu.dimension_semantics<parallel>], iteration_bounds = array<i64: 2>, scalar_prefetch = 0 : i64, scratch_operands = 0 : i64, tpu.core_type = #tpu.core_type<tc>, window_params = [{transform_indices = @transform_0, window_bounds = array<i64: 1, 16, 128>}, {pipeline_mode = #tpu.pipeline_mode<synchronous>, transform_indices = @transform_1, window_bounds = array<i64: 6, 128>}, {pipeline_mode = #tpu.pipeline_mode<synchronous>, transform_indices = @transform_2, window_bounds = array<i64: 128, 256>}, {pipeline_mode = #tpu.pipeline_mode<synchronous>, transform_indices = @transform_3, window_bounds = array<i64: 1, 256>}, {pipeline_mode = #tpu.pipeline_mode<synchronous>, transform_indices = @transform_4, window_bounds = array<i64: 8, 16>}, {pipeline_mode = #tpu.pipeline_mode<synchronous>, transform_indices = @transform_5, window_bounds = array<i64: 256, 128>}, {transform_indices = @transform_6, window_bounds = array<i64: 1, 8, 128>}, {transform_indices = @transform_7, window_bounds = array<i64: 1, 16, 128>}]} {
    %c0 = arith.constant 0 : index
    %c0_0 = arith.constant 0 : index
    %c0_1 = arith.constant 0 : index
    %0 = vector.load %arg1[%c0, %c0_0, %c0_1] : memref<1x16x128xf32, #tpu.memory_space<vmem>>, vector<1x16x128xf32>
    %1 = vector.shape_cast %0 : vector<1x16x128xf32> to vector<16x128xf32>
    %c0_2 = arith.constant 0 : index
    %c0_3 = arith.constant 0 : index
    %2 = vector.load %arg2[%c0_2, %c0_3] : memref<6x128xf32, #tpu.memory_space<vmem>>, vector<6x128xf32>
    %3 = vector.extract_strided_slice %2 {offsets = [0, 0], sizes = [1, 128], strides = [1, 1]} : vector<6x128xf32> to vector<1x128xf32>
    %4 = vector.extract_strided_slice %2 {offsets = [1, 0], sizes = [1, 128], strides = [1, 1]} : vector<6x128xf32> to vector<1x128xf32>
    %5 = vector.extract_strided_slice %2 {offsets = [2, 0], sizes = [1, 128], strides = [1, 1]} : vector<6x128xf32> to vector<1x128xf32>
    %6 = vector.extract_strided_slice %2 {offsets = [3, 0], sizes = [1, 128], strides = [1, 1]} : vector<6x128xf32> to vector<1x128xf32>
    %7 = vector.extract_strided_slice %2 {offsets = [4, 0], sizes = [1, 128], strides = [1, 1]} : vector<6x128xf32> to vector<1x128xf32>
    %8 = vector.extract_strided_slice %2 {offsets = [5, 0], sizes = [1, 128], strides = [1, 1]} : vector<6x128xf32> to vector<1x128xf32>
    %9 = tpu.iota {dimensions = array<i32: 0>} : vector<16x128xi32>
    %c16_i32 = arith.constant 16 : i32
    %c0_i32 = arith.constant 0 : i32
    %10 = arith.cmpi eq, %c16_i32, %c0_i32 : i32
    %c1_i32 = arith.constant 1 : i32
    %11 = arith.select %10, %c1_i32, %c16_i32 : i32
    %12 = vector.broadcast %11 : i32 to vector<16x128xi32>
    %13 = arith.remsi %9, %12 : vector<16x128xi32>
    %c0_i32_4 = arith.constant 0 : i32
    %14 = vector.broadcast %c0_i32_4 : i32 to vector<16x128xi32>
    %15 = arith.cmpi ne, %13, %14 : vector<16x128xi32>
    %c0_i32_5 = arith.constant 0 : i32
    %16 = vector.broadcast %c0_i32_5 : i32 to vector<16x128xi32>
    %17 = arith.cmpi slt, %13, %16 : vector<16x128xi32>
    %c0_i32_6 = arith.constant 0 : i32
    %18 = arith.cmpi slt, %11, %c0_i32_6 : i32
    %19 = vector.broadcast %18 : i1 to vector<16x128xi1>
    %20 = vector.broadcast %19 : vector<16x128xi1> to vector<16x128xi1>
    %21 = arith.xori %17, %20 : vector<16x128xi1>
    %22 = arith.andi %21, %15 : vector<16x128xi1>
    %23 = vector.broadcast %11 : i32 to vector<16x128xi32>
    %24 = arith.addi %13, %23 : vector<16x128xi32>
    %25 = arith.select %22, %24, %13 : vector<16x128xi1>, vector<16x128xi32>
    %c1_i32_7 = arith.constant 1 : i32
    %26 = tpu.dynamic_rotate %1 by %c1_i32_7 dim 0 : vector<16x128xf32>, i32 -> vector<16x128xf32>
    %c15_i32 = arith.constant 15 : i32
    %27 = tpu.dynamic_rotate %1 by %c15_i32 dim 0 : vector<16x128xf32>, i32 -> vector<16x128xf32>
    %c8_i32 = arith.constant 8 : i32
    %28 = tpu.dynamic_rotate %1 by %c8_i32 dim 1 : vector<16x128xf32>, i32 -> vector<16x128xf32>
    %c120_i32 = arith.constant 120 : i32
    %29 = tpu.dynamic_rotate %1 by %c120_i32 dim 1 : vector<16x128xf32>, i32 -> vector<16x128xf32>
    %30 = vector.broadcast %3 : vector<1x128xf32> to vector<16x128xf32>
    %31 = arith.mulf %1, %30 : vector<16x128xf32>
    %c0_i32_8 = arith.constant 0 : i32
    %32 = vector.broadcast %c0_i32_8 : i32 to vector<16x128xi32>
    %33 = arith.cmpi eq, %25, %32 : vector<16x128xi32>
    %cst = arith.constant 0.000000e+00 : f32
    %34 = vector.broadcast %cst : f32 to vector<16x128xf32>
    %35 = arith.select %33, %34, %26 : vector<16x128xi1>, vector<16x128xf32>
    %36 = vector.broadcast %4 : vector<1x128xf32> to vector<16x128xf32>
    %37 = arith.mulf %35, %36 : vector<16x128xf32>
    %38 = arith.addf %31, %37 : vector<16x128xf32>
    %c15_i32_9 = arith.constant 15 : i32
    %39 = vector.broadcast %c15_i32_9 : i32 to vector<16x128xi32>
    %40 = arith.cmpi eq, %25, %39 : vector<16x128xi32>
    %cst_10 = arith.constant 0.000000e+00 : f32
    %41 = vector.broadcast %cst_10 : f32 to vector<16x128xf32>
    %42 = arith.select %40, %41, %27 : vector<16x128xi1>, vector<16x128xf32>
    %43 = vector.broadcast %5 : vector<1x128xf32> to vector<16x128xf32>
    %44 = arith.mulf %42, %43 : vector<16x128xf32>
    %45 = arith.addf %38, %44 : vector<16x128xf32>
    %46 = vector.broadcast %6 : vector<1x128xf32> to vector<16x128xf32>
    %47 = arith.mulf %28, %46 : vector<16x128xf32>
    %48 = arith.addf %45, %47 : vector<16x128xf32>
    %49 = vector.broadcast %7 : vector<1x128xf32> to vector<16x128xf32>
    %50 = arith.mulf %29, %49 : vector<16x128xf32>
    %51 = arith.addf %48, %50 : vector<16x128xf32>
    %52 = vector.broadcast %8 : vector<1x128xf32> to vector<16x128xf32>
    %53 = arith.addf %51, %52 : vector<16x128xf32>
    %54 = vector.shape_cast %53 : vector<16x128xf32> to vector<1x16x128xf32>
    %c0_11 = arith.constant 0 : index
    %c0_12 = arith.constant 0 : index
    %c0_13 = arith.constant 0 : index
    %55 = vector.load %arg8[%c0_11, %c0_12, %c0_13] : memref<1x16x128xf32, #tpu.memory_space<vmem>>, vector<1x16x128xf32>
    tpu.vector_store %arg8[%c0_11, %c0_12, %c0_13], %54 {strides = array<i32>} : memref<1x16x128xf32, #tpu.memory_space<vmem>>, vector<1x16x128xf32>,
    %56 = arith.truncf %53 : vector<16x128xf32> to vector<16x128xbf16>
    %c0_14 = arith.constant 0 : index
    %c0_15 = arith.constant 0 : index
    %57 = vector.load %arg3[%c0_14, %c0_15] : memref<128x256xbf16, #tpu.memory_space<vmem>>, vector<128x256xbf16>
    %cst_16 = arith.constant dense<0.000000e+00> : vector<16x256xf32>
    %58 = tpu.matmul %56, %57, %cst_16 {dimension_numbers = #tpu.dot_dimension_numbers<[1], [0], [0], [1], [0, 0, 1, 1], [], []>} : vector<16x128xbf16>, vector<128x256xbf16>, vector<16x256xf32> -> vector<16x256xf32>
    %c0_17 = arith.constant 0 : index
    %c0_18 = arith.constant 0 : index
    %59 = vector.load %arg4[%c0_17, %c0_18] : memref<1x256xf32, #tpu.memory_space<vmem>>, vector<1x256xf32>
    %60 = vector.broadcast %59 : vector<1x256xf32> to vector<16x256xf32>
    %61 = arith.addf %58, %60 : vector<16x256xf32>
    %cst_19 = arith.constant 0.000000e+00 : f32
    %62 = vector.broadcast %cst_19 : f32 to vector<16x256xf32>
    %63 = arith.maximumf %61, %62 : vector<16x256xf32>
    %c15_i32_20 = arith.constant 15 : i32
    %64 = tpu.dynamic_rotate %63 by %c15_i32_20 dim 0 : vector<16x256xf32>, i32 -> vector<16x256xf32>
    %65 = arith.maximumf %63, %64 : vector<16x256xf32>
    %c0_21 = arith.constant 0 : index
    %c0_22 = arith.constant 0 : index
    %66 = vector.load %arg5[%c0_21, %c0_22] : memref<8x16xf32, #tpu.memory_space<vmem>>, vector<8x16xf32>
    %cst_23 = arith.constant dense<0.000000e+00> : vector<8x256xf32>
    %67 = tpu.matmul %66, %65, %cst_23 {dimension_numbers = #tpu.dot_dimension_numbers<[1], [0], [0], [1], [0, 0, 1, 1], [], []>} : vector<8x16xf32>, vector<16x256xf32>, vector<8x256xf32> -> vector<8x256xf32>
    %c240_i32 = arith.constant 240 : i32
    %68 = tpu.dynamic_rotate %67 by %c240_i32 dim 1 : vector<8x256xf32>, i32 -> vector<8x256xf32>
    %69 = arith.maximumf %67, %68 : vector<8x256xf32>
    %c0_24 = arith.constant 0 : index
    %c0_25 = arith.constant 0 : index
    %70 = vector.load %arg6[%c0_24, %c0_25] : memref<256x128xf32, #tpu.memory_space<vmem>>, vector<256x128xf32>
    %cst_26 = arith.constant dense<0.000000e+00> : vector<8x128xf32>
    %71 = tpu.matmul %69, %70, %cst_26 {dimension_numbers = #tpu.dot_dimension_numbers<[1], [0], [0], [1], [0, 0, 1, 1], [], []>} : vector<8x256xf32>, vector<256x128xf32>, vector<8x128xf32> -> vector<8x128xf32>
    %72 = vector.shape_cast %71 : vector<8x128xf32> to vector<1x8x128xf32>
    %c0_27 = arith.constant 0 : index
    %c0_28 = arith.constant 0 : index
    %c0_29 = arith.constant 0 : index
    %73 = vector.load %arg7[%c0_27, %c0_28, %c0_29] : memref<1x8x128xf32, #tpu.memory_space<vmem>>, vector<1x8x128xf32>
    tpu.vector_store %arg7[%c0_27, %c0_28, %c0_29], %72 {strides = array<i32>} : memref<1x8x128xf32, #tpu.memory_space<vmem>>, vector<1x8x128xf32>,
    return
  }
  func.func @transform_0(%arg0: i32) -> (i32, i32, i32) {
    %c0_i32 = arith.constant 0 : i32
    %c0_i32_0 = arith.constant 0 : i32
    %c0_i32_1 = arith.constant 0 : i32
    return %arg0, %c0_i32, %c0_i32_0 : i32, i32, i32
  }
  func.func @transform_1(%arg0: i32) -> (i32, i32) {
    %c0_i32 = arith.constant 0 : i32
    %c0_i32_0 = arith.constant 0 : i32
    %c0_i32_1 = arith.constant 0 : i32
    return %c0_i32, %c0_i32_0 : i32, i32
  }
  func.func @transform_2(%arg0: i32) -> (i32, i32) {
    %c0_i32 = arith.constant 0 : i32
    %c0_i32_0 = arith.constant 0 : i32
    %c0_i32_1 = arith.constant 0 : i32
    return %c0_i32, %c0_i32_0 : i32, i32
  }
  func.func @transform_3(%arg0: i32) -> (i32, i32) {
    %c0_i32 = arith.constant 0 : i32
    %c0_i32_0 = arith.constant 0 : i32
    %c0_i32_1 = arith.constant 0 : i32
    return %c0_i32, %c0_i32_0 : i32, i32
  }
  func.func @transform_4(%arg0: i32) -> (i32, i32) {
    %c0_i32 = arith.constant 0 : i32
    %c0_i32_0 = arith.constant 0 : i32
    %c0_i32_1 = arith.constant 0 : i32
    return %c0_i32, %c0_i32_0 : i32, i32
  }
  func.func @transform_5(%arg0: i32) -> (i32, i32) {
    %c0_i32 = arith.constant 0 : i32
    %c0_i32_0 = arith.constant 0 : i32
    %c0_i32_1 = arith.constant 0 : i32
    return %c0_i32, %c0_i32_0 : i32, i32
  }
  func.func @transform_6(%arg0: i32) -> (i32, i32, i32) {
    %c0_i32 = arith.constant 0 : i32
    %c0_i32_0 = arith.constant 0 : i32
    %c0_i32_1 = arith.constant 0 : i32
    return %arg0, %c0_i32, %c0_i32_0 : i32, i32, i32
  }
  func.func @transform_7(%arg0: i32) -> (i32, i32, i32) {
    %c0_i32 = arith.constant 0 : i32
    %c0_i32_0 = arith.constant 0 : i32
    %c0_i32_1 = arith.constant 0 : i32
    return %arg0, %c0_i32, %c0_i32_0 : i32, i32, i32
  }
}

</mosaic_0001>

<bundles_post_ra>
// kernel: _fwd.1
= control target key start
LH: loop header
LB: loop body
LE: loop exit
PB: predicated region body
PF: predicated region fallthrough
CT: control target
= control target key end

     0   :  { %s1672_s0 = inlined_call_operand.hbm [shape: f32[2,16,128], index: 0, kind: input, shape index: {}]   ;;  %s1673_s1 = inlined_call_operand.hbm [shape: f32[6,128], index: 1, kind: input, shape index: {}]   ;;  %s1674_s2 = inlined_call_operand.hbm [shape: bf16[128,256], index: 2, kind: input, shape index: {}]   ;;  %s1675_s3 = inlined_call_operand.vmem [shape: f32[1,256], index: 3, kind: input, shape index: {}]   ;;  %s1676_s4 = inlined_call_operand.hbm [shape: f32[8,16], index: 4, kind: input, shape index: {}]   ;;  %s1677_s5 = inlined_call_operand.hbm [shape: f32[256,128], index: 5, kind: input, shape index: {}]   ;;  %s1678_s6 = inlined_call_operand.hbm [shape: f32[2,8,128], index: 6, kind: output, shape index: {0}]   ;;  %s1679_s7 = inlined_call_operand.hbm [shape: f32[2,16,128], index: 7, kind: output, shape index: {1}]  }
   0x1   :  { %1683 = sst [smem:[#allocation19_spill]] %s1672_s0 }
   0x2   :  { %1684 = sst [smem:[#allocation20_spill]] %s1673_s1 }
   0x3   :  { %13 = vsyncpa [#allocation3], 0 }
   0x4   :  { %15 = vsyncpa [#allocation3 + $0x1], 0 }
   0x5   :  { %16 = vsyncpa [#allocation6], 0 }
   0x6   :  { %17 = vsyncpa [#allocation9], 0 }
   0x7   :  { %18 = vsyncpa [#allocation4], 0 }
   0x8   :  { %20 = vsyncpa [#allocation4 + $0x1], 0 }
   0x9   :  { %21 = vsyncpa [#allocation13], 0 }
   0xa   :  { %23 = vsyncpa [#allocation13 + $0x1], 0  ;;  %s1431_s24 = smov 0   ;;  %s1433_s25 = smov 0  }
   0xb   :  { %s1435_s26 = smov 0   ;;  %s1437_s27 = smov 0  }
   0xc LB: > { %s1452_s28 = sadd.s32 4294967295, %s1379_s27   ;;  %s911_s29 = sadd.s32 4294967294, %s1379_s27   ;;  %s1379_s27 = sphi %s1437_s27, %s1700_s27   ;;  %s1375_s26 = sphi %s1435_s26, %s1699_s26   ;;  %s1371_s25 = sphi %s1433_s25, %s1698_s25   ;;  %s1367_s24 = sphi %s1431_s24, %s1697_s24  }
   0xd   : > { %p49_p0 = scmp.ne.s32.totalorder %s1371_s25, %s1367_s24  ;;  %p50_p1 = scmp.eq.s32.totalorder %s1452_s28, 0 }
   0xe   : > { %p178_p2 = scmp.eq.s32.totalorder %s1452_s28, 1  ;;  %p184_p3 = scmp.eq.s32.totalorder %s911_s29, 1 }
   0xf   : > { %p1461_p4 = por %p50_p1, %p49_p0  ;;  %p912_p5 = scmp.ge.s32.totalorder %s1379_s27, 1 }
  0x10   : > { %p1466_p6 = por %p184_p3, %p49_p0  ;;  %p217_p7 = scmp.lt.s32.totalorder %s1379_s27, 3 }
  0x11   : > { %s1687_s1 = sld [smem:[#allocation20_spill]]  ;;  %s1381_s13 = smov [#allocation5]  }
  0x12   : > { %p1474_p8 = pnand %p912_p5, %p217_p7  ;;  %s231_s14 = sshll.u32 %s1381_s13, 4  ;;  %s232_s14 = int_to_ptr.vmem [resolvable:$true] %s231_s14 }
  0x13   : > { %s258_s17 = sshll.u32 %s1676_s4, 4  ;;  %s240_s21 = sshll.u32 %s1674_s2, 4  ;;  %s259_s17 = int_to_ptr.hbm [resolvable:$true] %s258_s17  ;;  %s241_s21 = int_to_ptr.hbm [resolvable:$true] %s240_s21 }
  0x14   : > { %p1042_p10 = pneg %p1474_p8  ;;  %s1382_s22 = smov [#allocation8]  }
  0x15   : > { %s260_s23 = sshll.u32 %s1382_s22, 4  ;;  %s1383_s29 = smov [#allocation7]   ;;  %s261_s23 = int_to_ptr.vmem [resolvable:$true] %s260_s23 }
  0x16   : > { %p1486_p11 = pnand %p1042_p10, %p50_p1  ;;  %s242_s9 = sshll.u32 %s1383_s29, 4  ;;  %s243_s9 = int_to_ptr.vmem [resolvable:$true] %s242_s9 }
  0x17   : > { %s229_s11 = sshll.u32 %s1687_s1, 4  ;;  %s269_s15 = sshll.u32 %s1677_s5, 4  ;;  %s230_s11 = int_to_ptr.hbm [resolvable:$true] %s229_s11  ;;  %s270_s15 = int_to_ptr.hbm [resolvable:$true] %s269_s15 }
  0x18   : > { %1045 = dma.hbm_to_vmem [thread:$0]  (!%p1486_p11), %s230_s11, 128, %s232_s14, [#allocation6]  }
  0x19   : > { %1051 = dma.hbm_to_vmem [thread:$0]  (!%p1486_p11), %s259_s17, 128, %s261_s23, [#allocation9]  }
  0x1a   : > { %s1680_s11 = smov 128   ;;  %s1681_s14 = smov 8  }
  0x1b   : > { %1048 = dma.hbm_to_vmem [thread:$0]  (!%p1486_p11), %s241_s21, 2048, %s243_s9, [#allocation6], %s1680_s11, %s1680_s11, %s1681_s14  }
  0x1c   : > { %s1386_s16 = smov [#allocation10]   ;;  %s1511_s19 = sadd.s32 1, %s1379_s27  }
  0x1d   : > { %s271_s17 = sshll.u32 %s1386_s16, 4  ;;  %s36_s20 = sadd.s32 1, %s1375_s26  ;;  %s272_s17 = int_to_ptr.vmem [resolvable:$true] %s271_s17 }
  0x1e   : > { %1054 = dma.hbm_to_vmem [thread:$0]  (!%p1486_p11), %s270_s15, 4096, %s272_s17, [#allocation9], %s1680_s11, %s1680_s11, %s1681_s14  }
  0x1f   : > { %s33_s22 = ssub.s32 %s1379_s27, %s1511_s19  ;;  %p43_p12 = scmp.ne.s32.totalorder %s1375_s26, %s1371_s25 }
  0x20   : > { %p34_p13 = scmp.eq.s32.totalorder %s33_s22, 0  ;;  %p44_p0 = scmp.eq.s32.totalorder %s1379_s27, 0 }
  0x21   : > { %p1521_p3 = por %p178_p2, %p43_p12  ;;  %p1070_p5 = scmp.lt.s32.totalorder %s1379_s27, 2 }
  0x22   : > { %s1527_s23 = scalar_select %p34_p13, %s1375_s26, %s36_s20  }
  0x23   : > { %p45_p7 = por %p44_p0, %p43_p12  ;;  %s285_s18 = sand.u32 1, %s1375_s26  }
  0x24   : > { %s918_s29 = sshll.u32 %s285_s18, 4  ;;  %s1002_s9 = sshll.u32 %s1379_s27, 4 }
  0x25   : > { %s1691_s0 = sld [smem:[#allocation19_spill]]  ;;  %s289_s16 = scalar_lea.vmem [#allocation2], %s918_s29 }
  0x26   : > { %s297_s17 = sshll.u32 %s289_s16, 4  ;;  %p1534_p2 = pnand %p1070_p5, %p45_p7  ;;  %s298_s17 = int_to_ptr.vmem [resolvable:$true] %s297_s17 }
  0x27   : > { %s286_s20 = scalar_lea.sflag [#allocation3], %s285_s18 }
  0x28   : > { %p1247_p11 = pneg %p1534_p2 }
  0x2b   : > { %s294_s15 = scalar_lea.hbm %s1691_s0, %s1002_s9  ;;  %s1250_s10 = scalar_lea.hbm %s1691_s0, 32 }
  0x2c   : > { %s295_s22 = sshll.u32 %s294_s15, 4  ;;  %s296_s22 = int_to_ptr.hbm [resolvable:$true] %s295_s22 }
  0x2d   : > { %s1243_s14 = sshra.s32 %s296_s22, 4  ;;  %s1244_s14 = int_to_ptr.hbm [resolvable:$true] %s1243_s14 }
  0x2e   : > { %s1245_s1 = scalar_lea.hbm %s1244_s14, 16  ;;  %p1251_p0 = scmp.lt.s32.totalorder %s1244_s14, %s1691_s0 }
  0x2f   : > { %p1246_p10 = scmp.ne.s32.totalorder %s1244_s14, %s1245_s1  ;;  %p1252_p5 = scmp.lt.s32.totalorder %s1250_s10, %s1245_s1 }
  0x31   : > { %p1248_p12 = pnand %p1247_p11, %p1246_p10  ;;  %p1253_p7 = por %p1252_p5, %p1251_p0 }
  0x33   : > { %p1249_p13 = pneg %p1248_p12 }
  0x35   : > { %p1254_p9 = pnand %p1253_p7, %p1249_p13 }
  0x37   : > { %1257 = shalt.err (!%p1254_p9)
}
  0x38   : > { %s1693_s18 = smov 8   ;;  %s1694_s16 = smov 128  }
  0x39   : > { %1058 = dma.hbm_to_vmem [thread:$0]  (!%p1534_p2), %s296_s22, 256, %s298_s17, %s286_s20, %s1694_s16, %s1694_s16, %s1693_s18  }
  0x3a   : > { %309 = sbr.rel (%p1474_p8) target bundleno = 715 (0x2cb), region = 44  ;;  %s1554_s9 = sand.u32 (!%p1474_p8), 1, %s1371_s25  }
  0x3b   : > { %s922_s1 = sshll.u32 (!%p1474_p8), %s1554_s9, 4  ;;  %s312_s14 = scalar_lea.sflag (!%p1474_p8), [#allocation3], %s1554_s9 }
  0x3c   : > { %s315_s29 = scalar_lea.vmem (!%p1474_p8), [#allocation2], %s922_s1 }
  0x3f   : > { %1346 = dma.done.wait (%p1461_p4), %s312_s14, 256  }
  0x40   : > { %1348 = vsyncadd (%p1461_p4), %s312_s14, 4294967040 }
  0x41   : > { %1350 = dma.done.wait (%p50_p1), [#allocation6], 2176  }
  0x42   : > { %1352 = vsyncadd (%p50_p1), [#allocation6], 4294965120 }
  0x43   : > { %1354 = dma.done.wait (%p50_p1), [#allocation9], 4224  }
  0x44   : > { %1356 = vsyncadd (%p50_p1), [#allocation9], 4294963072  ;;  %v1572_v0 = vld [vmem:[%s315_s29] sm:$0xff]  ;;  %v987_v1 = vld [vmem:[#allocation7 + $0x70] sm:$0xf]  ;;  %s1682_s12 = smov 8   ;;  %v375_v32 = vlaneseq }
  0x45   : > { %412 = vrot.lane.b32.xlu0 %v1572_v0, %s1682_s12  ;;  %s1388_s30 = smov 120   ;;  %v1018_v2 = vld [vmem:[#allocation7 + $0x74] sm:$0xf0]  ;;  %v1017_v3 = vld [vmem:[#allocation7 + $0x74] sm:$0xf]  ;;  %v402_v46 = vrot.slane %v1572_v0, 7 }
  0x46   : > { %416 = vrot.lane.b32.xlu1 %v1572_v0, %s1388_s30  ;;  %v988_v4 = vor.u32 %v1018_v2, %v987_v1  ;;  %v989_v5 = vld [vmem:[#allocation7 + $0x78] sm:$0xf0]  ;;  %v979_v6 = vld [vmem:[#allocation7 + $0x60] sm:$0xf]  ;;  %v1016_v7 = vld [vmem:[#allocation7 + $0x64] sm:$0xf0] }
  0x47   : > { %v992_v8 = vor.u32 %v1017_v3, %v989_v5  ;;  %v1015_v9 = vld [vmem:[#allocation7 + $0x64] sm:$0xf]  ;;  %v981_v10 = vld [vmem:[#allocation7 + $0x68] sm:$0xf0]  ;;  %v980_v11 = vor.u32 %v1016_v7, %v979_v6  ;;  %v971_v12 = vld [vmem:[#allocation7 + $0x50] sm:$0xf] }
  0x48   : > { %559 = vmatpush.bf16.msra.mxu0 %v988_v4  ;;  %v1014_v13 = vld [vmem:[#allocation7 + $0x54] sm:$0xf0]  ;;  %v1577_v14 = vld [vmem:[%s315_s29 + $0x8] sm:$0xff]  ;;  %v984_v15 = vor.u32 %v1015_v9, %v981_v10  ;;  %v973_v17 = vld [vmem:[#allocation7 + $0x58] sm:$0xf0]  ;;  %v1583_v39 = vshrl.u32 %v375_v32, 7 }
  0x49   : > { %573 = vmatpush.bf16.msra.mxu1 %v992_v8  ;;  %v1013_v16 = vld [vmem:[#allocation7 + $0x54] sm:$0xf]  ;;  %v972_v18 = vor.u32 %v1014_v13, %v971_v12  ;;  %v963_v19 = vld [vmem:[#allocation7 + $0x40] sm:$0xf]  ;;  %v1012_v20 = vld [vmem:[#allocation7 + $0x44] sm:$0xf0] }
  0x4a   : > { %v976_v21 = vor.u32 %v1013_v16, %v973_v17  ;;  %v1011_v22 = vld [vmem:[#allocation7 + $0x44] sm:$0xf]  ;;  %v965_v23 = vld [vmem:[#allocation7 + $0x48] sm:$0xf0]  ;;  %v964_v24 = vor.u32 %v1012_v20, %v963_v19  ;;  %v955_v26 = vld [vmem:[#allocation7 + $0x30] sm:$0xf] }
  0x4b   : > { %v968_v25 = vor.u32 %v1011_v22, %v965_v23  ;;  %v1010_v27 = vld [vmem:[#allocation7 + $0x34] sm:$0xf0]  ;;  %v1009_v29 = vld [vmem:[#allocation7 + $0x34] sm:$0xf]  ;;  %v957_v30 = vld [vmem:[#allocation7 + $0x38] sm:$0xf0] }
  0x4c   : > { %560 = vmatpush.bf16.msra.mxu0 %v980_v11  ;;  %v956_v28 = vor.u32 %v1010_v27, %v955_v26  ;;  %v960_v31 = vor.u32 %v1009_v29, %v957_v30  ;;  %v947_v33 = vld [vmem:[#allocation7 + $0x20] sm:$0xf]  ;;  %v1008_v34 = vld [vmem:[#allocation7 + $0x24] sm:$0xf0]  ;;  %v1007_v35 = vld [vmem:[#allocation7 + $0x24] sm:$0xf] }
  0x4d   : > { %414 = vrot.lane.b32.xlu0 %v1577_v14, %s1682_s12  ;;  %574 = vmatpush.bf16.msra.mxu1 %v984_v15  ;;  %v948_v36 = vor.u32 %v1008_v34, %v947_v33  ;;  %v949_v37 = vld [vmem:[#allocation7 + $0x28] sm:$0xf0]  ;;  %v939_v40 = vld [vmem:[#allocation7 + $0x10] sm:$0xf]  ;;  %v1006_v41 = vld [vmem:[#allocation7 + $0x14] sm:$0xf0] }
  0x4e   : > { %418 = vrot.lane.b32.xlu1 %v1577_v14, %s1388_s30  ;;  %v952_v38 = vor.u32 %v1007_v35, %v949_v37  ;;  %v1005_v42 = vld [vmem:[#allocation7 + $0x14] sm:$0xf]  ;;  %v940_v43 = vor.u32 %v1006_v41, %v939_v40  ;;  %v941_v44 = vld [vmem:[#allocation7 + $0x18] sm:$0xf0]  ;;  %v403_v47 = vrot.slane %v1577_v14, 7  ;;  %v382_v48 = vand.u32 15, %v1583_v39 }
  0x4f   : > { %v944_v45 = vor.u32 %v1005_v42, %v941_v44  ;;  %v931_v49 = vld [vmem:[#allocation7] sm:$0xf]  ;;  %v1004_v50 = vld [vmem:[#allocation7 + $0x4] sm:$0xf0]  ;;  %v1003_v51 = vld [vmem:[#allocation7 + $0x4] sm:$0xf] }
  0x50   : > { %561 = vmatpush.bf16.msra.mxu0 %v972_v18  ;;  %vm404_vm0 = vcmp.lt.s32.totalorder %v1583_v39, 1  ;;  %v932_v52 = vor.u32 %v1004_v50, %v931_v49  ;;  %v933_v53 = vld [vmem:[#allocation7 + $0x8] sm:$0xf0]  ;;  %v374_v55 = vld [vmem:[#allocation5] sm:$0x3f]  ;;  %vm423_vm1 = vcmp.eq.s32.totalorder %v382_v48, 0 }
  0x51   : > { %575 = vmatpush.bf16.msra.mxu1 %v976_v21  ;;  %v936_v54 = vor.u32 %v1003_v51, %v933_v53  ;;  %v406_v56 = vsel %vm404_vm0, %v403_v47, %v402_v46  ;;  %v420_v57 = vperm.slane %v374_v55, 0  ;;  %v427_v58 = vperm.slane %v374_v55, 1  ;;  %s1605_s11 = scalar_lea.vmem [#allocation12], %s922_s1  ;;  %v473_v34 = vld [vmem:[%s1675_s3] sm:$0x3]  ;;  %s1389_s20 = smov 112  }
  0x52   : > { %v408_v59 = vrot.slane %v1577_v14, 1  ;;  %v407_v60 = vrot.slane %v1572_v0, 1  ;;  %v425_v61 = vsel %vm423_vm1, 0.0, %v406_v56  ;;  %vm409_vm2 = vcmp.lt.s32.totalorder %v1583_v39, 7  ;;  %s764_s10 = sshll.u32 %s1605_s11, 4  ;;  %s1019_s13 = sshll.u32 %s1452_s28, 4  ;;  %s765_s10 = int_to_ptr.vmem [resolvable:$true] %s764_s10 }
  0x53   : > { %v377_v62 = vadd.s32 8, %v1583_v39  ;;  %v436_v63 = vperm.slane %v374_v55, 2  ;;  %v421_v1 = vmul.f32 %v420_v57, %v1572_v0  ;;  %v428_v2 = vmul.f32 %v427_v58, %v425_v61  ;;  %v672_v39 = vld [vmem:[#allocation10 + $0x68] sm:$0xff]  ;;  %s763_s16 = scalar_lea.hbm %s1679_s7, %s1019_s13  ;;  %s738_s14 = scalar_lea.sflag [#allocation13], %s1554_s9 }
  0x54   : > { %562 = vmatpush.bf16.msra.mxu0 %v964_v24  ;;  %v410_v3 = vsel %vm409_vm2, %v407_v60, %v408_v59  ;;  %v405_v7 = vsel %vm404_vm0, %v402_v46, %v403_v47  ;;  %v441_v8 = vperm.slane %v374_v55, 3  ;;  %v446_v9 = vperm.slane %v374_v55, 4  ;;  %s766_s1 = sshll.u32 %s763_s16, 4  ;;  %s767_s1 = int_to_ptr.hbm [resolvable:$true] %s766_s1 }
  0x55   : > { %576 = vmatpush.bf16.msra.mxu1 %v968_v25  ;;  %v389_v4 = vand.u32 15, %v377_v62  ;;  %v430_v5 = vadd.f32 %v428_v2, %v421_v1  ;;  %v437_v6 = vmul.f32 %v436_v63, %v410_v3  ;;  %v411_v10 = vsel %vm409_vm2, %v408_v59, %v407_v60  ;;  %v603_v62 = vld [vmem:[#allocation8] sm:$0xff]  ;;  %v673_v2 = vld [vmem:[#allocation10 + $0x70] sm:$0xff]  ;;  %s1287_s29 = sshra.s32 %s767_s1, 4  ;;  %s1288_s29 = int_to_ptr.hbm [resolvable:$true] %s1287_s29 }
  0x56   : > { %v422_v12 = vmul.f32 %v420_v57, %v1577_v14  ;;  %v429_v0 = vmul.f32 %v427_v58, %v405_v7  ;;  %v451_v22 = vperm.slane %v374_v55, 5  ;;  %v475_v37 = vperm.slane %v473_v34, 0  ;;  %v690_v1 = vld [vmem:[#allocation10 + $0xf8] sm:$0xff]  ;;  %v689_v3 = vld [vmem:[#allocation10 + $0xf0] sm:$0xff]  ;;  %s1289_s30 = scalar_lea.hbm %s1288_s29, 16  ;;  %p1294_p9 = scmp.lt.s32.totalorder %s1288_s29, %s1679_s7 }
  0x57   : > { %vm433_vm3 = vcmp.eq.s32.totalorder %v389_v4, 15  ;;  %v439_v11 = vadd.f32 %v437_v6, %v430_v5  ;;  %vm604_vm4 = vcmask 130048   ;;  %v688_v4 = vld [vmem:[#allocation10 + $0xe8] sm:$0xff]  ;;  %v671_v5 = vld [vmem:[#allocation10 + $0x60] sm:$0xff]  ;;  %v670_v7 = vld [vmem:[#allocation10 + $0x58] sm:$0xff]  ;;  %p1290_p1 = scmp.ne.s32.totalorder %s1288_s29, %s1289_s30 }
  0x58   : > { %563 = vmatpush.bf16.msra.mxu0 %v956_v28  ;;  %v435_v16 = vsel %vm433_vm3, 0.0, %v411_v10  ;;  %v431_v20 = vadd.f32 %v429_v0, %v422_v12  ;;  %v687_v6 = vld [vmem:[#allocation10 + $0xe0] sm:$0xff]  ;;  %v685_v10 = vld [vmem:[#allocation10 + $0xd0] sm:$0xff]  ;;  %v684_v12 = vld [vmem:[#allocation10 + $0xc8] sm:$0xff] }
  0x59   : > { %577 = vmatpush.bf16.msra.mxu1 %v960_v31  ;;  %v438_v21 = vmul.f32 %v436_v63, %v435_v16  ;;  %v674_v63 = vld [vmem:[#allocation10 + $0x78] sm:$0xff]  ;;  %v667_v0 = vld [vmem:[#allocation10 + $0x40] sm:$0xff]  ;;  %p1291_p4 = pnand %p1290_p1, %p1521_p3 }
  0x5a   : > { %v682_v16 = vld [vmem:[#allocation10 + $0xb8] sm:$0xff] }
  0x5b   : > { %v440_v24 = vadd.f32 %v438_v21, %v431_v20  ;;  %v680_v20 = vld [vmem:[#allocation10 + $0xa8] sm:$0xff]  ;;  %v663_v21 = vld [vmem:[#allocation10 + $0x20] sm:$0xff]  ;;  %p1292_p8 = pneg %p1291_p4 }
  0x5c   : > { %564 = vmatpush.bf16.msra.mxu0 %v948_v36 }
  0x5d   : > { %578 = vmatpush.bf16.msra.mxu1 %v952_v38  ;;  %v476_v38 = vperm.slane %v473_v34, 1  ;;  %v653_v34 = vand.u32 127, %v375_v32 }
  0x5f   : > { %vm654_vm5 = vcmp.lt.s32.totalorder %v653_v34, 112 }
  0x60   : > { %565 = vmatpush.bf16.msra.mxu0 %v940_v43 }
  0x61   : > { %579 = vmatpush.bf16.msra.mxu1 %v944_v45 }
  0x64   : > { %566 = vmatpush.bf16.msra.mxu0 %v932_v52 }
  0x65   : > { %580 = vmatpush.bf16.msra.mxu1 %v936_v54 }
  0xb7   : > { %v413_v13 = vpop.permute.xlu0 %412 }
  0xb8   : > { %v417_v15 = vpop.permute.xlu1 %416  ;;  %v442_v17 = vmul.f32 %v441_v8, %v413_v13  ;;  %v683_v13 = vld [vmem:[#allocation10 + $0xc0] sm:$0xff] }
  0xb9   : > { %v447_v18 = vmul.f32 %v446_v9, %v417_v15  ;;  %v666_v15 = vld [vmem:[#allocation10 + $0x38] sm:$0xff] }
  0xba   : > { %v444_v19 = vadd.f32 %v442_v17, %v439_v11  ;;  %v668_v11 = vld [vmem:[#allocation10 + $0x48] sm:$0xff]  ;;  %v665_v17 = vld [vmem:[#allocation10 + $0x30] sm:$0xff] }
  0xbc   : > { %v449_v23 = vadd.f32 %v447_v18, %v444_v19  ;;  %v681_v18 = vld [vmem:[#allocation10 + $0xb0] sm:$0xff]  ;;  %v664_v19 = vld [vmem:[#allocation10 + $0x28] sm:$0xff] }
  0xbe   : > { %v452_v25 = vadd.f32 %v451_v22, %v449_v23  ;;  %v662_v23 = vld [vmem:[#allocation10 + $0x18] sm:$0xff] }
  0xbf   : > { %v415_v26 = vpop.permute.xlu0 %414 }
  0xc0   : > { %v419_v27 = vpop.permute.xlu1 %418  ;;  %v443_v28 = vmul.f32 %v441_v8, %v415_v26  ;;  %454 = vst [vmem:[%s1605_s11] sm:$0xff] %v452_v25  ;;  %v686_v8 = vld [vmem:[#allocation10 + $0xd8] sm:$0xff] }
  0xc1   : > { %v448_v29 = vmul.f32 %v446_v9, %v419_v27  ;;  %v669_v9 = vld [vmem:[#allocation10 + $0x50] sm:$0xff] }
  0xc2   : > { %v445_v14 = vadd.f32 %v443_v28, %v440_v24  ;;  %v678_v24 = vld [vmem:[#allocation10 + $0x98] sm:$0xff]  ;;  %v661_v28 = vld [vmem:[#allocation10 + $0x10] sm:$0xff] }
  0xc4   : > { %v450_v30 = vadd.f32 %v448_v29, %v445_v14  ;;  %v677_v29 = vld [vmem:[#allocation10 + $0x90] sm:$0xff]  ;;  %v660_v14 = vld [vmem:[#allocation10 + $0x8] sm:$0xff] }
  0xc6   : > { %v453_v31 = vadd.f32 %v451_v22, %v450_v30  ;;  %v679_v22 = vld [vmem:[#allocation10 + $0xa0] sm:$0xff]  ;;  %v676_v30 = vld [vmem:[#allocation10 + $0x88] sm:$0xff] }
  0xc8   : > { %455 = vst [vmem:[%s1605_s11 + $0x8] sm:$0xff] %v453_v31  ;;  %v456_v33 = vpack.c.bf16 %v453_v31, %v452_v25  ;;  %v659_v31 = vld [vmem:[#allocation10] sm:$0xff]  ;;  %s1293_s11 = scalar_lea.hbm %s1679_s7, 32 }
  0xc9   : > { %p1295_p2 = scmp.lt.s32.totalorder %s1293_s11, %s1289_s30 }
  0xca   : > { %567 = vmatmul.bf16.vlgmr.msra.gmra.mxu0 %v456_v33  ;;  %581 = vmatmul.bf16.vlgmr.msra.gmra.mxu1 %v456_v33  ;;  %v675_v33 = vld [vmem:[#allocation10 + $0x80] sm:$0xff] }
  0xcb   : > { %p1296_p10 = por %p1295_p2, %p1294_p9 }
  0xcd   : > { %p1297_p11 = pnand %p1296_p10, %p1292_p8 }
 0x147   : > { %v568_v35 = vpop.f32.mrf.mxu0  ;;  %v582_v36 = vpop.f32.mrf.mxu1 }
 0x148   : > { %v569_v40 = vadd.f32 %v568_v35, %v475_v37  ;;  %v583_v41 = vadd.f32 %v582_v36, %v476_v38 }
 0x14a   : > { %v587_v44 = vmax.f32 %v569_v40, 0.0  ;;  %v588_v45 = vmax.f32 %v583_v41, 0.0 }
 0x14c   : > { %v591_v50 = vrot.slane %v587_v44, 1  ;;  %v592_v51 = vrot.slane %v588_v45, 1 }
 0x14f   : > { %v570_v42 = vpop.f32.mrf.mxu0  ;;  %v584_v43 = vpop.f32.mrf.mxu1 }
 0x150   : > { %v571_v46 = vadd.f32 %v570_v42, %v475_v37  ;;  %v585_v47 = vadd.f32 %v584_v43, %v476_v38 }
 0x152   : > { %v589_v48 = vmax.f32 %v571_v46, 0.0  ;;  %v590_v49 = vmax.f32 %v585_v47, 0.0 }
 0x154   : > { %v593_v52 = vrot.slane %v589_v48, 1  ;;  %v594_v53 = vrot.slane %v590_v49, 1 }
 0x156   : > { %v597_v54 = vsel %vm409_vm2, %v593_v52, %v591_v50  ;;  %v598_v55 = vsel %vm409_vm2, %v594_v53, %v592_v51  ;;  %v595_v56 = vsel %vm409_vm2, %v591_v50, %v593_v52  ;;  %v596_v57 = vsel %vm409_vm2, %v592_v51, %v594_v53 }
 0x157   : > { %v601_v58 = vmax.f32 %v589_v48, %v597_v54  ;;  %v602_v59 = vmax.f32 %v590_v49, %v598_v55  ;;  %v599_v60 = vmax.f32 %v587_v44, %v595_v56  ;;  %v600_v61 = vmax.f32 %v588_v45, %v596_v57 }
 0x159   : > { %622 = vmatpush.msra.mxu2 %v601_v58  ;;  %642 = vmatpush.msra.mxu3 %v602_v59 }
 0x15b   : > { %623 = vmatpush.msra.mxu2 %v599_v60  ;;  %643 = vmatpush.msra.mxu3 %v600_v61 }
 0x15c   : > { %993 = vmatmul.msk.f32.vlgmr.msra.gmra.mxu2 %vm604_vm4, %v603_v62  ;;  %994 = vmatmul.msk.f32.vlgmr.msra.gmra.mxu3 %vm604_vm4, %v603_v62 }
 0x15d   : > { %691 = vmatpush.msrb.mxu2 %v674_v63  ;;  %711 = vmatpush.msrb.mxu3 %v690_v1 }
 0x15f   : > { %692 = vmatpush.msrb.mxu2 %v673_v2  ;;  %712 = vmatpush.msrb.mxu3 %v689_v3 }
 0x161   : > { %693 = vmatpush.msrb.mxu2 %v672_v39  ;;  %713 = vmatpush.msrb.mxu3 %v688_v4 }
 0x163   : > { %694 = vmatpush.msrb.mxu2 %v671_v5  ;;  %714 = vmatpush.msrb.mxu3 %v687_v6 }
 0x165   : > { %695 = vmatpush.msrb.mxu2 %v670_v7  ;;  %715 = vmatpush.msrb.mxu3 %v686_v8 }
 0x167   : > { %696 = vmatpush.msrb.mxu2 %v669_v9  ;;  %716 = vmatpush.msrb.mxu3 %v685_v10 }
 0x169   : > { %697 = vmatpush.msrb.mxu2 %v668_v11  ;;  %717 = vmatpush.msrb.mxu3 %v684_v12 }
 0x16b   : > { %698 = vmatpush.msrb.mxu2 %v667_v0  ;;  %718 = vmatpush.msrb.mxu3 %v683_v13 }
 0x16d   : > { %699 = vmatpush.msrb.mxu2 %v666_v15  ;;  %719 = vmatpush.msrb.mxu3 %v682_v16 }
 0x16f   : > { %700 = vmatpush.msrb.mxu2 %v665_v17  ;;  %720 = vmatpush.msrb.mxu3 %v681_v18 }
 0x171   : > { %701 = vmatpush.msrb.mxu2 %v664_v19  ;;  %721 = vmatpush.msrb.mxu3 %v680_v20 }
 0x173   : > { %702 = vmatpush.msrb.mxu2 %v663_v21  ;;  %722 = vmatpush.msrb.mxu3 %v679_v22 }
 0x175   : > { %703 = vmatpush.msrb.mxu2 %v662_v23  ;;  %723 = vmatpush.msrb.mxu3 %v678_v24 }
 0x177   : > { %704 = vmatpush.msrb.mxu2 %v661_v28  ;;  %724 = vmatpush.msrb.mxu3 %v677_v29 }
 0x179   : > { %705 = vmatpush.msrb.mxu2 %v660_v14  ;;  %725 = vmatpush.msrb.mxu3 %v676_v30 }
 0x17b   : > { %706 = vmatpush.msrb.mxu2 %v659_v31  ;;  %726 = vmatpush.msrb.mxu3 %v675_v33 }
 0x1df   : > { %v625_v25 = vpop.f32.mrf.mxu2  ;;  %v645_v26 = vpop.f32.mrf.mxu3 }
 0x1e0   : > { %v1118_v27 = vpack.i.bf16 %v645_v26, %v625_v25 }
 0x1e2   : > { %1119 = vrot.lane.b32.xlu2 %v1118_v27, %s1389_s20 }
 0x23c   : > { %v1120_v35 = vpop.permute.xlu2 %1119 }
 0x23d   : > { %v1122_v36 = vunpack.i.h.bf16 %v1120_v35  ;;  %v1121_v37 = vunpack.i.l.bf16 %v1120_v35 }
 0x23f   : > { %v655_v38 = vsel %vm654_vm5, %v1121_v37, %v1122_v36  ;;  %v656_v40 = vsel %vm654_vm5, %v1122_v36, %v1121_v37 }
 0x240   : > { %v657_v41 = vmax.f32 %v625_v25, %v655_v38  ;;  %v658_v42 = vmax.f32 %v645_v26, %v656_v40 }
 0x242   : > { %707 = vmatmul.f32.vlgmr.msrb.gmra.mxu2 %v657_v41  ;;  %727 = vmatmul.f32.vlgmr.msrb.gmra.mxu3 %v658_v42 }
 0x243   : > { %1300 = shalt.err (!%p1297_p11)
}
 0x244   : > { %s1390_s13 = smov 128   ;;  %s1695_s15 = smov 8  }
 0x245   : > { %1039 = dma.vmem_to_hbm [thread:$0]  (%p1521_p3), %s765_s10, 256, %s767_s1, %s738_s14, %s1390_s13, %s1390_s13, %s1695_s15  }
 0x246   : > { %s927_s18 = sshll.u32 %s1554_s9, 3  ;;  %s997_s16 = sshll.u32 %s1452_s28, 3 }
 0x247   : > { %s748_s12 = scalar_lea.hbm %s1678_s6, %s997_s16  ;;  %s364_s29 = scalar_lea.vmem [#allocation11], %s927_s18 }
 0x248   : > { %s750_s30 = sshll.u32 %s364_s29, 4  ;;  %s752_s11 = sshll.u32 %s748_s12, 4  ;;  %s751_s30 = int_to_ptr.vmem [resolvable:$true] %s750_s30  ;;  %s753_s11 = int_to_ptr.hbm [resolvable:$true] %s752_s11 }
 0x249   : > { %s733_s20 = scalar_lea.sflag [#allocation4], %s1554_s9  ;;  %s1315_s0 = sshra.s32 %s753_s11, 4  ;;  %s1316_s0 = int_to_ptr.hbm [resolvable:$true] %s1315_s0 }
 0x24a   : > { %s1317_s10 = scalar_lea.hbm %s1316_s0, 8  ;;  %s1321_s14 = scalar_lea.hbm %s1678_s6, 16 }
 0x24b   : > { %p1318_p12 = scmp.ne.s32.totalorder %s1316_s0, %s1317_s10  ;;  %p1322_p5 = scmp.lt.s32.totalorder %s1316_s0, %s1678_s6 }
 0x24c   : > { %p1323_p7 = scmp.lt.s32.totalorder %s1321_s14, %s1317_s10 }
 0x24d   : > { %p1319_p13 = pnand %p1318_p12, %p1521_p3 }
 0x24e   : > { %p1324_p1 = por %p1323_p7, %p1322_p5 }
 0x24f   : > { %p1320_p0 = pneg %p1319_p13 }
 0x251   : > { %p1325_p4 = pnand %p1324_p1, %p1320_p0 }
 0x2c5   : > { %v708_v32 = vpop.f32.mrf.mxu2  ;;  %v728_v43 = vpop.f32.mrf.mxu3 }
 0x2c6   : > { %v729_v44 = vadd.f32 %v728_v43, %v708_v32 }
 0x2c8   : > { %731 = vst [vmem:[%s364_s29] sm:$0xff] %v729_v44 }
 0x2c9   : > { %1328 = shalt.err (!%p1325_p4)
}
 0x2ca   : > { %1038 = dma.vmem_to_hbm [thread:$0]  (%p1521_p3), %s751_s30, 128, %s753_s11, %s733_s20  }
 0x2cb PF: > { %s781_s9 = sand.u32 1, %s1367_s24   ;;  %p1696_p8 = scmp.ge.s32.totalorder %s1379_s27, 2 }
 0x2cc   : > { %s782_s18 = scalar_lea.sflag [#allocation4], %s781_s9 }
 0x2cd   : > { %p1060_p9 = pnand %p1696_p8, %p1466_p6 }
 0x2cf   : > { %p1061_p2 = pneg %p1060_p9 }
 0x2d1   : > { %1358 = dma.done.wait (%p1061_p2), %s782_s18, 128  }
 0x2d2   : > { %1360 = vsyncadd (%p1061_p2), %s782_s18, 4294967168  ;;  %s792_s0 = scalar_lea.sflag [#allocation13], %s781_s9 }
 0x2d3   : > { %1362 = dma.done.wait (%p1061_p2), %s792_s0, 256  }
 0x2d4   : > { %1364 = vsyncadd (%p1061_p2), %s792_s0, 4294967040  ;;  %p26_p3 = scmp.ge.s32.totalorder %s1511_s19, 4   ;;  %s1697_s24 = smov %s1371_s25 }
 0x2d5   : > { %s1698_s25 = smov %s1375_s26  ;;  %s1699_s26 = smov %s1527_s23 }
 0x2d6   : > { %s1700_s27 = smov %s1511_s19  ;;  %28 = sbr.rel (!%p26_p3) target bundleno = 12 (0xc), region = 122 }
 0x2db   :  { %798 = vsyncpa [#allocation3], 1 }
 0x2dc   :  { %800 = vsyncpa [#allocation3 + $0x1], 1 }
 0x2dd   :  { %801 = vsyncpa [#allocation6], 1 }
 0x2de   :  { %802 = vsyncpa [#allocation9], 1 }
 0x2df   :  { %803 = vsyncpa [#allocation4], 1 }
 0x2e0   :  { %805 = vsyncpa [#allocation4 + $0x1], 1 }
 0x2e1   :  { %806 = vsyncpa [#allocation13], 1 }
 0x2e2   :  { %808 = vsyncpa [#allocation13 + $0x1], 1 }

</bundles_post_ra>
